<compile_context>
chip_gen: v5e
topology: v5e:2x2
jax: 0.10.0
libtpu: 0.0.40
codegen_flags: <defaults>
</compile_context>

<pallas_src>
import functools

import jax
import jax.numpy as jnp
from jax.experimental import pallas as pl
from jax.experimental.pallas import tpu as pltpu

LANE = 128


# ------------------------------ small helpers -------------------------------

def _round_up(x, m):
    return (x + m - 1) // m * m


def _pad2(a, rows, cols):
    return jnp.pad(a, ((0, rows - a.shape[0]), (0, cols - a.shape[1])))


def _vmem_limit_bytes():
    """Generation-aware scoped-VMEM cap: ~75% of physical, at most 100 MiB."""
    try:
        phys = pltpu.get_tpu_info().vmem_capacity_bytes
    except Exception:
        phys = 64 * 1024 * 1024  # conservative (v7x physical VMEM per TC)
    return min(int(phys) * 3 // 4, 100 * 1024 * 1024)


def _divisor_tile(n_pad, cap):
    """Largest multiple of LANE that divides n_pad and is <= cap (>= LANE)."""
    assert n_pad % LANE == 0
    best = LANE
    for t in range(LANE, min(max(cap, LANE), n_pad) + 1, LANE):
        if n_pad % t == 0:
            best = t
    return best


def _pick_row_tile(n_pad, cap):
    """Row tile for the aggregation: guarantee >=2 row tiles when possible so
    the 'parallel' row axis can shard across v7x's two TensorCores."""
    if n_pad // LANE >= 2:
        cap = min(cap, n_pad // 2)
    return _divisor_tile(n_pad, cap)


# --------------------------------- kernels ----------------------------------

def _linear_kernel(x_ref, w_ref, o_ref):
    o_ref[...] = jnp.dot(x_ref[...], w_ref[...],
                         preferred_element_type=jnp.float32).astype(o_ref.dtype)


def _linear(x, w, bm, vmem_limit):
    """Row-tiled x @ w (bf16 operands, f32 accumulate, bf16 out)."""
    n_pad, f_in = x.shape
    f_out = w.shape[1]
    cost = pl.CostEstimate(
        flops=2 * n_pad * f_in * f_out,
        transcendentals=0,
        bytes_accessed=2 * (n_pad * f_in + f_in * f_out + n_pad * f_out))
    return pl.pallas_call(
        _linear_kernel,
        out_shape=jax.ShapeDtypeStruct((n_pad, f_out), jnp.bfloat16),
        grid_spec=pltpu.PrefetchScalarGridSpec(
            num_scalar_prefetch=0,
            grid=(n_pad // bm,),
            in_specs=[pl.BlockSpec((bm, f_in), lambda i: (i, 0)),
                      pl.BlockSpec((f_in, f_out), lambda i: (0, 0))],
            out_specs=pl.BlockSpec((bm, f_out), lambda i: (i, 0)),
        ),
        compiler_params=pltpu.CompilerParams(
            dimension_semantics=("parallel",),
            vmem_limit_bytes=vmem_limit),
        cost_estimate=cost,
    )(x, w)


def _make_agg_kernel(epilogue, num_valid, bk, xw_resident):
    """A_hat-tile aggregation with a fused epilogue ('relu' or 'log_softmax').

    If xw_resident, xw_ref holds the full (n_pad, f_out) operand (fetched once
    per layer) and we slice the k-th (bk, f_out) panel; otherwise xw_ref is the
    streamed (bk, f_out) block.
    """
    def kernel(a_ref, xw_ref, b_ref, o_ref, acc_ref):
        k = pl.program_id(1)

        @pl.when(k == 0)
        def _():
            acc_ref[...] = jnp.zeros_like(acc_ref)

        if xw_resident:
            start = pl.multiple_of(k * bk, LANE)
            xw = xw_ref[pl.ds(start, bk), :]
        else:
            xw = xw_ref[...]

        acc_ref[...] += jnp.dot(a_ref[...], xw,
                                preferred_element_type=jnp.float32)

        @pl.when(k == pl.num_programs(1) - 1)
        def _():
            z = acc_ref[...] + b_ref[...]
            if epilogue == "relu":
                o_ref[...] = jnp.maximum(z, 0.0).astype(o_ref.dtype)
            else:
                # Mask padded class lanes so the lse covers only real classes;
                # padded lanes are written as 0.0 (never -inf/NaN).
                lane = jax.lax.broadcasted_iota(jnp.int32, z.shape, 1)
                zm = jnp.where(lane < num_valid, z, -jnp.inf)
                m = jnp.max(zm, axis=1, keepdims=True)
                lse = jnp.log(jnp.sum(jnp.exp(zm - m), axis=1,
                                      keepdims=True)) + m
                o_ref[...] = jnp.where(lane < num_valid, zm - lse,
                                       0.0).astype(o_ref.dtype)

    return kernel


def _aggregate(a, xw, b, bm, bk, *, epilogue, out_dtype, vmem_limit,
               num_valid=None):
    """Tiled A_hat @ xw + b with fused epilogue (f32 accumulator over k)."""
    n_pad = a.shape[0]
    f_out = xw.shape[1]
    k_steps = n_pad // bk
    n_row_tiles = n_pad // bm
    out_bytes = jnp.dtype(out_dtype).itemsize

    # Hold xw VMEM-resident (one HBM fetch per layer) when it fits comfortably.
    base_vmem = (2 * bm * bk * 2          # A_hat double-buffered tiles
                 + 2 * bm * f_out * 4     # output tiles (worst case f32)
                 + bm * f_out * 4         # accumulator scratch
                 + 2 * f_out * 4)         # bias
    resident_vmem = 2 * n_pad * f_out * 2
    xw_resident = (k_steps > 1
                   and base_vmem + resident_vmem <= int(0.6 * vmem_limit))

    xw_spec = (pl.BlockSpec((n_pad, f_out), lambda i, k: (0, 0))
               if xw_resident
               else pl.BlockSpec((bk, f_out), lambda i, k: (k, 0)))
    xw_fetches = 1 if (xw_resident or k_steps == 1) else n_row_tiles
    cost = pl.CostEstimate(
        flops=2 * n_pad * n_pad * f_out,
        transcendentals=(n_pad * f_out if epilogue == "log_softmax" else 0),
        bytes_accessed=(2 * n_pad * n_pad
                        + 2 * n_pad * f_out * xw_fetches
                        + 4 * f_out
                        + out_bytes * n_pad * f_out))

    kernel = _make_agg_kernel(epilogue, num_valid, bk, xw_resident)
    # TODO(synk): when the k loop is very short, pipeline_mode=pl.Buffered(3)
    #             on the A_hat stream could hide the first-fetch latency.
    return pl.pallas_call(
        kernel,
        out_shape=jax.ShapeDtypeStruct((n_pad, f_out), out_dtype),
        grid_spec=pltpu.PrefetchScalarGridSpec(
            num_scalar_prefetch=0,
            grid=(n_row_tiles, k_steps),
            in_specs=[pl.BlockSpec((bm, bk), lambda i, k: (i, k)),
                      xw_spec,
                      pl.BlockSpec((1, f_out), lambda i, k: (0, 0))],
            out_specs=pl.BlockSpec((bm, f_out), lambda i, k: (i, 0)),
            scratch_shapes=[pltpu.VMEM((bm, f_out), jnp.float32)],
        ),
        compiler_params=pltpu.CompilerParams(
            dimension_semantics=("parallel", "arbitrary"),
            vmem_limit_bytes=vmem_limit),
        cost_estimate=cost,
    )(a, xw, b)


def _fused_gcn_kernel(num_classes, a_ref, x_ref, w1_ref, b1_ref, w2_ref,
                      b2_ref, o_ref):
    """Whole 2-layer GCN in one VMEM-resident shot (small graphs)."""
    a = a_ref[...]                                                   # bf16
    xw1 = jnp.dot(x_ref[...], w1_ref[...],
                  preferred_element_type=jnp.float32)
    h = jnp.maximum(
        jnp.dot(a, xw1.astype(jnp.bfloat16),
                preferred_element_type=jnp.float32) + b1_ref[...], 0.0)
    hw2 = jnp.dot(h.astype(jnp.bfloat16), w2_ref[...],
                  preferred_element_type=jnp.float32)
    z = jnp.dot(a, hw2.astype(jnp.bfloat16),
                preferred_element_type=jnp.float32) + b2_ref[...]
    lane = jax.lax.broadcasted_iota(jnp.int32, z.shape, 1)
    zm = jnp.where(lane < num_classes, z, -jnp.inf)
    m = jnp.max(zm, axis=1, keepdims=True)
    lse = jnp.log(jnp.sum(jnp.exp(zm - m), axis=1, keepdims=True)) + m
    o_ref[...] = jnp.where(lane < num_classes, zm - lse, 0.0)


def _fused_forward(a_p, x_p, w1_p, b1_p, w2_p, b2_p, num_classes, vmem_limit):
    n_pad = a_p.shape[0]
    f_pad = x_p.shape[1]
    h_pad = w1_p.shape[1]
    c_pad = w2_p.shape[1]
    cost = pl.CostEstimate(
        flops=2 * n_pad * (f_pad * h_pad + n_pad * h_pad
                           + h_pad * c_pad + n_pad * c_pad),
        transcendentals=n_pad * c_pad,
        bytes_accessed=(2 * (n_pad * n_pad + n_pad * f_pad
                             + f_pad * h_pad + h_pad * c_pad)
                        + 4 * n_pad * c_pad))
    return pl.pallas_call(
        functools.partial(_fused_gcn_kernel, num_classes),
        out_shape=jax.ShapeDtypeStruct((n_pad, c_pad), jnp.float32),
        compiler_params=pltpu.CompilerParams(vmem_limit_bytes=vmem_limit),
        cost_estimate=cost,
    )(a_p, x_p, w1_p, b1_p, w2_p, b2_p)


# --------------------------------- forward ----------------------------------

def gcn2_forward(a_hat, x, w1, b1, w2, b2, *, block_m=512, block_k=1024,
                 force_tiled=False):
    """log_softmax(GCNConv2(relu(GCNConv1(x)))) with dense A_hat."""
    n, f_in = x.shape
    hidden = w1.shape[1]
    c = w2.shape[1]

    # Pad only to the 128-lane granule (no quadratic inflation of A_hat).
    n_pad = _round_up(n, LANE)
    f_pad = _round_up(f_in, LANE)
    h_pad = _round_up(hidden, LANE)
    c_pad = _round_up(c, LANE)

    vmem_limit = _vmem_limit_bytes()

    # bf16 streaming operands (f32 accumulation inside kernels), zero pads.
    a_p = _pad2(a_hat, n_pad, n_pad).astype(jnp.bfloat16)
    x_p = _pad2(x, n_pad, f_pad).astype(jnp.bfloat16)
    w1_p = _pad2(w1, f_pad, h_pad).astype(jnp.bfloat16)
    w2_p = _pad2(w2, h_pad, c_pad).astype(jnp.bfloat16)
    b1_p = _pad2(b1, 1, h_pad).astype(jnp.float32)
    b2_p = _pad2(b2, 1, c_pad).astype(jnp.float32)

    # ---- Fully fused path: whole problem resident in VMEM (WebKB scale). ----
    fused_bytes = (2 * n_pad * n_pad                       # A_hat (bf16)
                   + 2 * n_pad * f_pad                     # x
                   + 2 * (f_pad * h_pad + h_pad * c_pad)   # weights
                   + 4 * n_pad * (2 * h_pad + 2 * c_pad)   # f32 intermediates
                   + 4 * n_pad * c_pad)                    # f32 output
    if (not force_tiled) and fused_bytes <= int(0.4 * vmem_limit):
        z = _fused_forward(a_p, x_p, w1_p, b1_p, w2_p, b2_p, c, vmem_limit)
        return z[:n, :c]

    # ---- Tiled / streaming path for larger graphs. --------------------------
    bm = _pick_row_tile(n_pad, block_m)            # aggregation row tile
    bk = _divisor_tile(n_pad, block_k)             # aggregation k tile
    lin_bm = _divisor_tile(n_pad, max(block_m, 512))   # linear gets its own
    assert bm % LANE == 0 and n_pad % bm == 0
    assert bk % LANE == 0 and n_pad % bk == 0
    assert lin_bm % LANE == 0 and n_pad % lin_bm == 0

    # Layer 1: h = relu(A_hat @ (x @ W1) + b1)
    xw1 = _linear(x_p, w1_p, lin_bm, vmem_limit)
    h = _aggregate(a_p, xw1, b1_p, bm, bk, epilogue="relu",
                   out_dtype=jnp.bfloat16, vmem_limit=vmem_limit)

    # Layer 2: log_softmax(A_hat @ (h @ W2) + b2)
    hw2 = _linear(h, w2_p, lin_bm, vmem_limit)
    z = _aggregate(a_p, hw2, b2_p, bm, bk, epilogue="log_softmax",
                   out_dtype=jnp.float32, vmem_limit=vmem_limit, num_valid=c)

    return z[:n, :c]


# --------------------------- graph glue / reference --------------------------

def build_normalized_adjacency(edge_index, edge_weight, num_nodes):
    """Dense A_hat = D^{-1/2} (A + I) D^{-1/2}, matching PyG gcn_norm."""
    src, dst = edge_index[0], edge_index[1]
    a = jnp.zeros((num_nodes, num_nodes), jnp.float32)
    a = a.at[dst, src].add(edge_weight)            # A[i, j] = weight of edge j->i
    a = a + jnp.eye(num_nodes, dtype=jnp.float32)  # self loops (weight 1)
    deg = jnp.sum(a, axis=1)
    d_inv_sqrt = jnp.where(deg > 0, jax.lax.rsqrt(deg), 0.0)
    return d_inv_sqrt[:, None] * a * d_inv_sqrt[None, :]


def reference_forward(a_hat, x, w1, b1, w2, b2):
    h = jnp.maximum(a_hat @ (x @ w1) + b1, 0.0)
    z = a_hat @ (h @ w2) + b2
    return jax.nn.log_softmax(z, axis=1)


def reference_forward_bf16(a_hat, x, w1, b1, w2, b2):
    """Same math, with the kernel's bf16 casts, for a tight numerics check."""
    bf = lambda t: t.astype(jnp.bfloat16).astype(jnp.float32)
    a = bf(a_hat)
    xw1 = bf(bf(x) @ bf(w1))
    h = bf(jnp.maximum(a @ xw1 + b1, 0.0))
    hw2 = bf(h @ bf(w2))
    z = a @ hw2 + b2
    return jax.nn.log_softmax(z, axis=1)


# ----------------------------------- main ------------------------------------

if __name__ == "__main__":

    def make_case(n, f_in, hidden, c, key):
        k_x, k_w1, k_b1, k_w2, k_b2, k_ew = jax.random.split(key, 6)
        x = jax.random.normal(k_x, (n, f_in), jnp.float32)
        # Deterministic graph: bidirectional ring + a few extra edges.
        idx = jnp.arange(n)
        ring_src = jnp.concatenate([idx, (idx + 1) % n])
        ring_dst = jnp.concatenate([(idx + 1) % n, idx])
        extra_src = jnp.array([0, 3, 5, 7], jnp.int32) % n
        extra_dst = jnp.array([8, 12, 10, 14], jnp.int32) % n
        src = jnp.concatenate([ring_src, extra_src]).astype(jnp.int32)
        dst = jnp.concatenate([ring_dst, extra_dst]).astype(jnp.int32)
        edge_index = jnp.stack([src, dst])
        edge_weight = jax.random.uniform(k_ew, (src.shape[0],), jnp.float32,
                                         minval=0.5, maxval=1.5)
        w1 = jax.random.normal(k_w1, (f_in, hidden), jnp.float32) / jnp.sqrt(f_in)
        b1 = jax.random.normal(k_b1, (1, hidden), jnp.float32) * 0.01
        w2 = jax.random.normal(k_w2, (hidden, c), jnp.float32) / jnp.sqrt(hidden)
        b2 = jax.random.normal(k_b2, (1, c), jnp.float32) * 0.01
        a_hat = build_normalized_adjacency(edge_index, edge_weight, n)
        return a_hat, x, w1, b1, w2, b2

    key = jax.random.PRNGKey(0)
    k1, k2 = jax.random.split(key)

    # Case 1: small WebKB-like graph -> fully fused single-kernel path.
    N1, C1 = 16, 8
    args1 = make_case(N1, 32, 16, C1, k1)
    out1 = jax.block_until_ready(gcn2_forward(*args1))
    assert out1.shape == (N1, C1)
    assert bool(jnp.all(jnp.isfinite(out1)))
    assert jnp.allclose(out1, reference_forward_bf16(*args1), atol=5e-3, rtol=5e-3)
    assert jnp.allclose(out1, reference_forward(*args1), atol=1e-1, rtol=1e-1)

    # Case 2: force the tiled/streaming path (multi row-tile, multi k-step,
    # VMEM-resident xw) on a slightly larger graph.
    N2, C2 = 300, 8
    args2 = make_case(N2, 48, 16, C2, k2)
    out2 = jax.block_until_ready(
        gcn2_forward(*args2, block_m=128, block_k=128, force_tiled=True))
    assert out2.shape == (N2, C2)
    assert bool(jnp.all(jnp.isfinite(out2)))
    assert jnp.allclose(out2, reference_forward_bf16(*args2), atol=5e-3, rtol=5e-3)
    assert jnp.allclose(out2, reference_forward(*args2), atol=1e-1, rtol=1e-1)

    print("KERNEL_OK")
</pallas_src>

<mosaic_0001>
module attributes {stable_mosaic.version = 11 : i64} {
  func.func @_fused_gcn_kernel(%arg0: memref<128x128xbf16, #tpu.memory_space<vmem>>, %arg1: memref<128x128xbf16, #tpu.memory_space<vmem>>, %arg2: memref<128x128xbf16, #tpu.memory_space<vmem>>, %arg3: memref<1x128xf32, #tpu.memory_space<vmem>>, %arg4: memref<128x128xbf16, #tpu.memory_space<vmem>>, %arg5: memref<1x128xf32, #tpu.memory_space<vmem>>, %arg6: memref<128x128xf32, #tpu.memory_space<vmem>>) attributes {dimension_semantics = [], scalar_prefetch = 0 : i64, scratch_operands = 0 : i64, tpu.core_type = #tpu.core_type<tc>} {
    %c0 = arith.constant 0 : index
    %c0_0 = arith.constant 0 : index
    %0 = vector.load %arg0[%c0, %c0_0] : memref<128x128xbf16, #tpu.memory_space<vmem>>, vector<128x128xbf16>
    %c0_1 = arith.constant 0 : index
    %c0_2 = arith.constant 0 : index
    %1 = vector.load %arg1[%c0_1, %c0_2] : memref<128x128xbf16, #tpu.memory_space<vmem>>, vector<128x128xbf16>
    %c0_3 = arith.constant 0 : index
    %c0_4 = arith.constant 0 : index
    %2 = vector.load %arg2[%c0_3, %c0_4] : memref<128x128xbf16, #tpu.memory_space<vmem>>, vector<128x128xbf16>
    %cst = arith.constant dense<0.000000e+00> : vector<128x128xf32>
    %3 = tpu.matmul %1, %2, %cst {dimension_numbers = #tpu.dot_dimension_numbers<[1], [0], [0], [1], [0, 0, 1, 1], [], []>} : vector<128x128xbf16>, vector<128x128xbf16>, vector<128x128xf32> -> vector<128x128xf32>
    %4 = arith.truncf %3 : vector<128x128xf32> to vector<128x128xbf16>
    %cst_5 = arith.constant dense<0.000000e+00> : vector<128x128xf32>
    %5 = tpu.matmul %0, %4, %cst_5 {dimension_numbers = #tpu.dot_dimension_numbers<[1], [0], [0], [1], [0, 0, 1, 1], [], []>} : vector<128x128xbf16>, vector<128x128xbf16>, vector<128x128xf32> -> vector<128x128xf32>
    %c0_6 = arith.constant 0 : index
    %c0_7 = arith.constant 0 : index
    %6 = vector.load %arg3[%c0_6, %c0_7] : memref<1x128xf32, #tpu.memory_space<vmem>>, vector<1x128xf32>
    %7 = vector.broadcast %6 : vector<1x128xf32> to vector<128x128xf32>
    %8 = arith.addf %5, %7 : vector<128x128xf32>
    %cst_8 = arith.constant 0.000000e+00 : f32
    %9 = vector.broadcast %cst_8 : f32 to vector<128x128xf32>
    %10 = arith.maximumf %8, %9 : vector<128x128xf32>
    %11 = arith.truncf %10 : vector<128x128xf32> to vector<128x128xbf16>
    %c0_9 = arith.constant 0 : index
    %c0_10 = arith.constant 0 : index
    %12 = vector.load %arg4[%c0_9, %c0_10] : memref<128x128xbf16, #tpu.memory_space<vmem>>, vector<128x128xbf16>
    %cst_11 = arith.constant dense<0.000000e+00> : vector<128x128xf32>
    %13 = tpu.matmul %11, %12, %cst_11 {dimension_numbers = #tpu.dot_dimension_numbers<[1], [0], [0], [1], [0, 0, 1, 1], [], []>} : vector<128x128xbf16>, vector<128x128xbf16>, vector<128x128xf32> -> vector<128x128xf32>
    %14 = arith.truncf %13 : vector<128x128xf32> to vector<128x128xbf16>
    %cst_12 = arith.constant dense<0.000000e+00> : vector<128x128xf32>
    %15 = tpu.matmul %0, %14, %cst_12 {dimension_numbers = #tpu.dot_dimension_numbers<[1], [0], [0], [1], [0, 0, 1, 1], [], []>} : vector<128x128xbf16>, vector<128x128xbf16>, vector<128x128xf32> -> vector<128x128xf32>
    %c0_13 = arith.constant 0 : index
    %c0_14 = arith.constant 0 : index
    %16 = vector.load %arg5[%c0_13, %c0_14] : memref<1x128xf32, #tpu.memory_space<vmem>>, vector<1x128xf32>
    %17 = vector.broadcast %16 : vector<1x128xf32> to vector<128x128xf32>
    %18 = arith.addf %15, %17 : vector<128x128xf32>
    %19 = tpu.iota {dimensions = array<i32: 1>} : vector<128x128xi32>
    %c8_i32 = arith.constant 8 : i32
    %20 = vector.broadcast %c8_i32 : i32 to vector<128x128xi32>
    %21 = arith.cmpi slt, %19, %20 : vector<128x128xi32>
    %cst_15 = arith.constant 0xFF800000 : f32
    %22 = vector.broadcast %cst_15 : f32 to vector<128x128xf32>
    %23 = arith.select %21, %18, %22 : vector<128x128xi1>, vector<128x128xf32>
    %cst_16 = arith.constant dense<0xFF800000> : vector<128xf32>
    %24 = vector.multi_reduction <maximumf>, %23, %cst_16 [1] : vector<128x128xf32> to vector<128xf32>
    %25 = vector.shape_cast %24 : vector<128xf32> to vector<128x1xf32>
    %26 = vector.broadcast %25 : vector<128x1xf32> to vector<128x128xf32>
    %27 = arith.subf %23, %26 : vector<128x128xf32>
    %28 = math.exp %27 : vector<128x128xf32>
    %cst_17 = arith.constant dense<0.000000e+00> : vector<128xf32>
    %29 = vector.multi_reduction <add>, %28, %cst_17 [1] : vector<128x128xf32> to vector<128xf32>
    %30 = vector.shape_cast %29 : vector<128xf32> to vector<128x1xf32>
    %31 = math.log %30 : vector<128x1xf32>
    %32 = arith.addf %31, %25 : vector<128x1xf32>
    %c8_i32_18 = arith.constant 8 : i32
    %33 = vector.broadcast %c8_i32_18 : i32 to vector<128x128xi32>
    %34 = arith.cmpi slt, %19, %33 : vector<128x128xi32>
    %35 = vector.broadcast %32 : vector<128x1xf32> to vector<128x128xf32>
    %36 = arith.subf %23, %35 : vector<128x128xf32>
    %cst_19 = arith.constant 0.000000e+00 : f32
    %37 = vector.broadcast %cst_19 : f32 to vector<128x128xf32>
    %38 = arith.select %34, %36, %37 : vector<128x128xi1>, vector<128x128xf32>
    %c0_20 = arith.constant 0 : index
    %c0_21 = arith.constant 0 : index
    %39 = vector.load %arg6[%c0_20, %c0_21] : memref<128x128xf32, #tpu.memory_space<vmem>>, vector<128x128xf32>
    tpu.vector_store %arg6[%c0_20, %c0_21], %38 {strides = array<i32>} : memref<128x128xf32, #tpu.memory_space<vmem>>, vector<128x128xf32>,
    return
  }
}

</mosaic_0001>

<bundles_post_ra>
// kernel: tpu_custom_call.1
= control target key start
LH: loop header
LB: loop body
LE: loop exit
PB: predicated region body
PF: predicated region fallthrough
CT: control target
= control target key end

     0   :  { %11 = vsyncpa [#allocation3], 0  ;;  %s1524_s0 = inlined_call_operand.hbm [shape: bf16[128,128], index: 0, kind: input, shape index: {}]   ;;  %s1525_s1 = inlined_call_operand.hbm [shape: bf16[128,128], index: 1, kind: input, shape index: {}]   ;;  %s1526_s2 = inlined_call_operand.hbm [shape: bf16[128,128], index: 2, kind: input, shape index: {}]   ;;  %s1527_s3 = inlined_call_operand.vmem [shape: f32[1,128], index: 3, kind: input, shape index: {}]   ;;  %s1528_s4 = inlined_call_operand.hbm [shape: bf16[128,128], index: 4, kind: input, shape index: {}]   ;;  %s1529_s5 = inlined_call_operand.vmem [shape: f32[1,128], index: 5, kind: input, shape index: {}]   ;;  %s1530_s6 = inlined_call_operand.hbm [shape: f32[128,128], index: 6, kind: output, shape index: {}]  }
   0x1   :  { %12 = vsyncpa [#allocation6], 0 }
   0x2   :  { %13 = vsyncpa [#allocation9], 0 }
   0x3   :  { %14 = vsyncpa [#allocation4], 0  ;;  %s32_s23 = sshll.u32 %s1525_s1, 4  ;;  %s1198_s24 = smov [#allocation5]   ;;  %s33_s23 = int_to_ptr.hbm [resolvable:$true] %s32_s23 }
   0x4   :  { %s34_s25 = sshll.u32 %s1198_s24, 4  ;;  %s19_s28 = sshll.u32 %s1524_s0, 4  ;;  %s35_s25 = int_to_ptr.vmem [resolvable:$true] %s34_s25  ;;  %s20_s28 = int_to_ptr.hbm [resolvable:$true] %s19_s28 }
   0x5   :  { %s1199_s29 = smov 64   ;;  %s1200_s30 = smov 4  }
   0x6   :  { %40 = dma.hbm_to_vmem [thread:$0]  %s33_s23, 1024, %s35_s25, [#allocation6], %s1199_s29, %s1199_s29, %s1200_s30  }
   0x7   :  { %s1201_s7 = smov [#allocation2]   ;;  %s45_s11 = sshll.u32 %s1526_s2, 4  ;;  %s46_s11 = int_to_ptr.hbm [resolvable:$true] %s45_s11 }
   0x8   :  { %s21_s8 = sshll.u32 %s1201_s7, 4  ;;  %s60_s13 = sshll.u32 %s1528_s4, 4  ;;  %s22_s8 = int_to_ptr.vmem [resolvable:$true] %s21_s8  ;;  %s61_s13 = int_to_ptr.hbm [resolvable:$true] %s60_s13 }
   0x9   :  { %27 = dma.hbm_to_vmem [thread:$0]  %s20_s28, 1024, %s22_s8, [#allocation3], %s1199_s29, %s1199_s29, %s1200_s30  }
   0xa   :  { %s1202_s14 = smov [#allocation7]   ;;  %s1203_s0 = smov [#allocation8]  }
   0xb   :  { %s47_s15 = sshll.u32 %s1202_s14, 4  ;;  %s62_s16 = sshll.u32 %s1203_s0, 4  ;;  %s48_s15 = int_to_ptr.vmem [resolvable:$true] %s47_s15  ;;  %s63_s16 = int_to_ptr.vmem [resolvable:$true] %s62_s16 }
   0xc   :  { %53 = dma.hbm_to_vmem [thread:$0]  %s46_s11, 1024, %s48_s15, [#allocation6], %s1199_s29, %s1199_s29, %s1200_s30  }
   0xd   :  { %68 = dma.hbm_to_vmem [thread:$0]  %s61_s13, 1024, %s63_s16, [#allocation9], %s1199_s29, %s1199_s29, %s1200_s30  }
   0xe   :  { %1190 = dma.done.wait [#allocation3], 1024  }
   0xf   :  { %1191 = vsyncadd [#allocation3], 4294966272 }
  0x10   :  { %1192 = dma.done.wait [#allocation6], 2048  }
  0x11   :  { %1193 = vsyncadd [#allocation6], 4294965248 }
  0x12   :  { %1194 = dma.done.wait [#allocation9], 1024  }
  0x13   :  { %1195 = vsyncadd [#allocation9], 4294966272  ;;  %v986_v0 = vld [vmem:[#allocation7 + $0x38] sm:$0xff]  ;;  %v985_v1 = vld [vmem:[#allocation7 + $0x30] sm:$0xff]  ;;  %s820_s21 = sshll.u32 %s1530_s6, 4  ;;  %s1205_s22 = smov 128   ;;  %s821_s21 = int_to_ptr.hbm [resolvable:$true] %s820_s21 }
  0x14   :  { %231 = vmatpush.bf16.msra.mxu0 %v986_v0  ;;  %v984_v2 = vld [vmem:[#allocation7 + $0x28] sm:$0xff]  ;;  %v983_v3 = vld [vmem:[#allocation7 + $0x20] sm:$0xff]  ;;  %v982_v4 = vld [vmem:[#allocation7 + $0x18] sm:$0xff]  ;;  %s1206_s23 = smov 8  }
  0x15   :  { %v981_v5 = vld [vmem:[#allocation7 + $0x10] sm:$0xff]  ;;  %v980_v6 = vld [vmem:[#allocation7 + $0x8] sm:$0xff]  ;;  %v979_v7 = vld [vmem:[#allocation7] sm:$0xff] }
  0x16   :  { %v971_v8 = vld [vmem:[#allocation5] sm:$0xff]  ;;  %v972_v9 = vld [vmem:[#allocation5 + $0x8] sm:$0xff]  ;;  %v973_v10 = vld [vmem:[#allocation5 + $0x10] sm:$0xff] }
  0x17   :  { %v974_v11 = vld [vmem:[#allocation5 + $0x18] sm:$0xff]  ;;  %v975_v12 = vld [vmem:[#allocation5 + $0x20] sm:$0xff]  ;;  %v976_v13 = vld [vmem:[#allocation5 + $0x28] sm:$0xff] }
  0x18   :  { %232 = vmatpush.bf16.msra.mxu0 %v985_v1  ;;  %v977_v14 = vld [vmem:[#allocation5 + $0x30] sm:$0xff]  ;;  %v978_v15 = vld [vmem:[#allocation5 + $0x38] sm:$0xff]  ;;  %v1254_v40 = vld [vmem:[#allocation2] sm:$0xff] }
  0x19   :  { %v1257_v41 = vld [vmem:[#allocation2 + $0x8] sm:$0xff]  ;;  %v1260_v42 = vld [vmem:[#allocation2 + $0x10] sm:$0xff]  ;;  %v1263_v43 = vld [vmem:[#allocation2 + $0x18] sm:$0xff] }
  0x1a   :  { %v1266_v44 = vld [vmem:[#allocation2 + $0x20] sm:$0xff]  ;;  %v994_v45 = vld [vmem:[#allocation8 + $0x38] sm:$0xff]  ;;  %v1269_v46 = vld [vmem:[#allocation2 + $0x28] sm:$0xff] }
  0x1b   :  { %477 = vmatpush.bf16.msra.mxu2 %v994_v45  ;;  %v993_v47 = vld [vmem:[#allocation8 + $0x30] sm:$0xff]  ;;  %v992_v48 = vld [vmem:[#allocation8 + $0x28] sm:$0xff]  ;;  %v991_v49 = vld [vmem:[#allocation8 + $0x20] sm:$0xff] }
  0x1c   :  { %233 = vmatpush.bf16.msra.mxu0 %v984_v2  ;;  %v990_v50 = vld [vmem:[#allocation8 + $0x18] sm:$0xff]  ;;  %v1272_v51 = vld [vmem:[#allocation2 + $0x30] sm:$0xff]  ;;  %v988_v53 = vld [vmem:[#allocation8 + $0x8] sm:$0xff] }
  0x1d   :  { %v989_v52 = vld [vmem:[#allocation8 + $0x10] sm:$0xff]  ;;  %v987_v54 = vld [vmem:[#allocation8] sm:$0xff]  ;;  %v1275_v55 = vld [vmem:[#allocation2 + $0x38] sm:$0xff] }
  0x1e   :  { %v1004_v57 = vld [vmem:[%s1527_s3] ss:$0 sm:$0xff] }
  0x1f   :  { %478 = vmatpush.bf16.msra.mxu2 %v993_v47 }
  0x20   :  { %234 = vmatpush.bf16.msra.mxu0 %v983_v3 }
  0x23   :  { %479 = vmatpush.bf16.msra.mxu2 %v992_v48 }
  0x24   :  { %235 = vmatpush.bf16.msra.mxu0 %v982_v4 }
  0x27   :  { %480 = vmatpush.bf16.msra.mxu2 %v991_v49 }
  0x28   :  { %236 = vmatpush.bf16.msra.mxu0 %v981_v5 }
  0x2b   :  { %481 = vmatpush.bf16.msra.mxu2 %v990_v50 }
  0x2c   :  { %237 = vmatpush.bf16.msra.mxu0 %v980_v6 }
  0x2f   :  { %482 = vmatpush.bf16.msra.mxu2 %v989_v52 }
  0x30   :  { %238 = vmatpush.bf16.msra.mxu0 %v979_v7 }
  0x33   :  { %239 = vmatmul.bf16.vlgmr.msra.gmra.mxu0 %v971_v8  ;;  %483 = vmatpush.bf16.msra.mxu2 %v988_v53 }
  0x37   :  { %484 = vmatpush.bf16.msra.mxu2 %v987_v54 }
  0x43   :  { %244 = vmatmul.bf16.gmra.mxu0 %v972_v9 }
  0x53   :  { %249 = vmatmul.bf16.gmra.mxu0 %v973_v10 }
  0x63   :  { %254 = vmatmul.bf16.gmra.mxu0 %v974_v11 }
  0x73   :  { %259 = vmatmul.bf16.gmra.mxu0 %v975_v12 }
  0x83   :  { %264 = vmatmul.bf16.gmra.mxu0 %v976_v13 }
  0x93   :  { %269 = vmatmul.bf16.gmra.mxu0 %v977_v14 }
  0xa3   :  { %274 = vmatmul.bf16.gmra.mxu0 %v978_v15 }
  0xb0   :  { %v240_v16 = vpop.f32.mrf.mxu0 }
  0xb8   :  { %v242_v17 = vpop.f32.mrf.mxu0 }
  0xb9   :  { %v280_v18 = vpack.c.bf16 %v242_v17, %v240_v16 }
  0xc0   :  { %v245_v19 = vpop.f32.mrf.mxu0 }
  0xc8   :  { %v247_v20 = vpop.f32.mrf.mxu0 }
  0xc9   :  { %v281_v21 = vpack.c.bf16 %v247_v20, %v245_v19 }
  0xd0   :  { %v250_v22 = vpop.f32.mrf.mxu0 }
  0xd8   :  { %v252_v23 = vpop.f32.mrf.mxu0 }
  0xd9   :  { %v282_v24 = vpack.c.bf16 %v252_v23, %v250_v22 }
  0xe0   :  { %v255_v25 = vpop.f32.mrf.mxu0 }
  0xe8   :  { %v257_v26 = vpop.f32.mrf.mxu0 }
  0xe9   :  { %v283_v27 = vpack.c.bf16 %v257_v26, %v255_v25 }
  0xf0   :  { %v260_v28 = vpop.f32.mrf.mxu0 }
  0xf8   :  { %v262_v29 = vpop.f32.mrf.mxu0 }
  0xf9   :  { %v284_v39 = vpack.c.bf16 %v262_v29, %v260_v28 }
 0x100   :  { %v265_v30 = vpop.f32.mrf.mxu0 }
 0x108   :  { %v267_v31 = vpop.f32.mrf.mxu0 }
 0x109   :  { %v285_v38 = vpack.c.bf16 %v267_v31, %v265_v30 }
 0x110   :  { %v270_v32 = vpop.f32.mrf.mxu0 }
 0x118   :  { %v272_v33 = vpop.f32.mrf.mxu0 }
 0x119   :  { %v286_v37 = vpack.c.bf16 %v272_v33, %v270_v32 }
 0x120   :  { %v275_v34 = vpop.f32.mrf.mxu0 }
 0x128   :  { %v277_v35 = vpop.f32.mrf.mxu0 }
 0x129   :  { %v287_v36 = vpack.c.bf16 %v277_v35, %v275_v34 }
 0x12b   :  { %340 = vmatpush.bf16.msra.mxu1 %v287_v36 }
 0x12f   :  { %341 = vmatpush.bf16.msra.mxu1 %v286_v37 }
 0x133   :  { %342 = vmatpush.bf16.msra.mxu1 %v285_v38 }
 0x137   :  { %343 = vmatpush.bf16.msra.mxu1 %v284_v39 }
 0x13b   :  { %344 = vmatpush.bf16.msra.mxu1 %v283_v27 }
 0x13f   :  { %345 = vmatpush.bf16.msra.mxu1 %v282_v24 }
 0x143   :  { %346 = vmatpush.bf16.msra.mxu1 %v281_v21 }
 0x147   :  { %347 = vmatpush.bf16.msra.mxu1 %v280_v18 }
 0x14a   :  { %348 = vmatmul.bf16.vlgmr.msra.gmra.mxu1 %v1254_v40 }
 0x15a   :  { %353 = vmatmul.bf16.gmra.mxu1 %v1257_v41 }
 0x16a   :  { %358 = vmatmul.bf16.gmra.mxu1 %v1260_v42 }
 0x17a   :  { %363 = vmatmul.bf16.gmra.mxu1 %v1263_v43 }
 0x18a   :  { %368 = vmatmul.bf16.gmra.mxu1 %v1266_v44 }
 0x19a   :  { %373 = vmatmul.bf16.gmra.mxu1 %v1269_v46 }
 0x1aa   :  { %378 = vmatmul.bf16.gmra.mxu1 %v1272_v51 }
 0x1ba   :  { %383 = vmatmul.bf16.gmra.mxu1 %v1275_v55 }
 0x1c7   :  { %v349_v56 = vpop.f32.mrf.mxu1 }
 0x1c8   :  { %v350_v58 = vadd.f32 %v1004_v57, %v349_v56 }
 0x1ca   :  { %v389_v61 = vmax.f32 %v350_v58, 0.0 }
 0x1cf   :  { %v351_v59 = vpop.f32.mrf.mxu1 }
 0x1d0   :  { %v352_v60 = vadd.f32 %v1004_v57, %v351_v59 }
 0x1d2   :  { %v390_v62 = vmax.f32 %v352_v60, 0.0 }
 0x1d4   :  { %v405_v63 = vpack.c.bf16 %v390_v62, %v389_v61 }
 0x1d6   :  { %485 = vmatmul.bf16.vlgmr.msra.gmra.mxu2 %v405_v63 }
 0x1d7   :  { %v354_v0 = vpop.f32.mrf.mxu1 }
 0x1d8   :  { %v355_v1 = vadd.f32 %v1004_v57, %v354_v0 }
 0x1da   :  { %v391_v4 = vmax.f32 %v355_v1, 0.0 }
 0x1df   :  { %v356_v2 = vpop.f32.mrf.mxu1 }
 0x1e0   :  { %v357_v3 = vadd.f32 %v1004_v57, %v356_v2 }
 0x1e2   :  { %v392_v5 = vmax.f32 %v357_v3, 0.0 }
 0x1e4   :  { %v406_v6 = vpack.c.bf16 %v392_v5, %v391_v4 }
 0x1e6   :  { %490 = vmatmul.bf16.gmra.mxu2 %v406_v6 }
 0x1e7   :  { %v359_v7 = vpop.f32.mrf.mxu1 }
 0x1e8   :  { %v360_v8 = vadd.f32 %v1004_v57, %v359_v7 }
 0x1ea   :  { %v393_v11 = vmax.f32 %v360_v8, 0.0 }
 0x1ef   :  { %v361_v9 = vpop.f32.mrf.mxu1 }
 0x1f0   :  { %v362_v10 = vadd.f32 %v1004_v57, %v361_v9 }
 0x1f2   :  { %v394_v12 = vmax.f32 %v362_v10, 0.0 }
 0x1f4   :  { %v407_v13 = vpack.c.bf16 %v394_v12, %v393_v11 }
 0x1f6   :  { %495 = vmatmul.bf16.gmra.mxu2 %v407_v13 }
 0x1f7   :  { %v364_v14 = vpop.f32.mrf.mxu1 }
 0x1f8   :  { %v365_v15 = vadd.f32 %v1004_v57, %v364_v14 }
 0x1fa   :  { %v395_v18 = vmax.f32 %v365_v15, 0.0 }
 0x1ff   :  { %v366_v16 = vpop.f32.mrf.mxu1 }
 0x200   :  { %v367_v17 = vadd.f32 %v1004_v57, %v366_v16 }
 0x202   :  { %v396_v19 = vmax.f32 %v367_v17, 0.0  ;;  %v587_v17 = vlaneseq }
 0x204   :  { %v408_v20 = vpack.c.bf16 %v396_v19, %v395_v18  ;;  %v1289_v18 = vand.u32 127, %v587_v17 }
 0x206   :  { %500 = vmatmul.bf16.gmra.mxu2 %v408_v20  ;;  %vm589_vm0 = vcmp.lt.s32.totalorder %v1289_v18, 8 }
 0x207   :  { %v369_v21 = vpop.f32.mrf.mxu1 }
 0x208   :  { %v370_v22 = vadd.f32 %v1004_v57, %v369_v21 }
 0x20a   :  { %v397_v25 = vmax.f32 %v370_v22, 0.0 }
 0x20f   :  { %v371_v23 = vpop.f32.mrf.mxu1 }
 0x210   :  { %v372_v24 = vadd.f32 %v1004_v57, %v371_v23 }
 0x212   :  { %v398_v26 = vmax.f32 %v372_v24, 0.0 }
 0x214   :  { %v409_v27 = vpack.c.bf16 %v398_v26, %v397_v25 }
 0x216   :  { %505 = vmatmul.bf16.gmra.mxu2 %v409_v27 }
 0x217   :  { %v374_v28 = vpop.f32.mrf.mxu1 }
 0x218   :  { %v375_v29 = vadd.f32 %v1004_v57, %v374_v28 }
 0x21a   :  { %v399_v32 = vmax.f32 %v375_v29, 0.0 }
 0x21f   :  { %v376_v30 = vpop.f32.mrf.mxu1 }
 0x220   :  { %v377_v31 = vadd.f32 %v1004_v57, %v376_v30 }
 0x222   :  { %v400_v33 = vmax.f32 %v377_v31, 0.0 }
 0x224   :  { %v410_v34 = vpack.c.bf16 %v400_v33, %v399_v32 }
 0x226   :  { %510 = vmatmul.bf16.gmra.mxu2 %v410_v34 }
 0x227   :  { %v379_v35 = vpop.f32.mrf.mxu1 }
 0x228   :  { %v380_v36 = vadd.f32 %v1004_v57, %v379_v35 }
 0x22a   :  { %v401_v39 = vmax.f32 %v380_v36, 0.0 }
 0x22f   :  { %v381_v37 = vpop.f32.mrf.mxu1 }
 0x230   :  { %v382_v38 = vadd.f32 %v1004_v57, %v381_v37 }
 0x232   :  { %v402_v45 = vmax.f32 %v382_v38, 0.0 }
 0x234   :  { %v411_v47 = vpack.c.bf16 %v402_v45, %v401_v39 }
 0x236   :  { %515 = vmatmul.bf16.gmra.mxu2 %v411_v47 }
 0x237   :  { %v384_v48 = vpop.f32.mrf.mxu1 }
 0x238   :  { %v385_v49 = vadd.f32 %v1004_v57, %v384_v48 }
 0x23a   :  { %v403_v53 = vmax.f32 %v385_v49, 0.0 }
 0x23f   :  { %v386_v50 = vpop.f32.mrf.mxu1 }
 0x240   :  { %v387_v52 = vadd.f32 %v1004_v57, %v386_v50 }
 0x242   :  { %v404_v54 = vmax.f32 %v387_v52, 0.0 }
 0x244   :  { %v412_v56 = vpack.c.bf16 %v404_v54, %v403_v53 }
 0x246   :  { %520 = vmatmul.bf16.gmra.mxu2 %v412_v56 }
 0x259   :  { %v486_v58 = vpop.f32.mrf.mxu2 }
 0x261   :  { %v488_v59 = vpop.f32.mrf.mxu2 }
 0x262   :  { %v526_v60 = vpack.c.bf16 %v488_v59, %v486_v58 }
 0x269   :  { %v491_v61 = vpop.f32.mrf.mxu2 }
 0x271   :  { %v493_v62 = vpop.f32.mrf.mxu2 }
 0x272   :  { %v527_v63 = vpack.c.bf16 %v493_v62, %v491_v61 }
 0x279   :  { %v496_v0 = vpop.f32.mrf.mxu2 }
 0x281   :  { %v498_v1 = vpop.f32.mrf.mxu2 }
 0x282   :  { %v528_v2 = vpack.c.bf16 %v498_v1, %v496_v0 }
 0x289   :  { %v501_v3 = vpop.f32.mrf.mxu2 }
 0x291   :  { %v503_v4 = vpop.f32.mrf.mxu2 }
 0x292   :  { %v529_v5 = vpack.c.bf16 %v503_v4, %v501_v3 }
 0x299   :  { %v506_v6 = vpop.f32.mrf.mxu2 }
 0x2a1   :  { %v508_v7 = vpop.f32.mrf.mxu2 }
 0x2a2   :  { %v530_v16 = vpack.c.bf16 %v508_v7, %v506_v6 }
 0x2a9   :  { %v511_v8 = vpop.f32.mrf.mxu2 }
 0x2b1   :  { %v513_v57 = vpop.f32.mrf.mxu2 }
 0x2b2   :  { %v531_v15 = vpack.c.bf16 %v513_v57, %v511_v8 }
 0x2b9   :  { %v516_v9 = vpop.f32.mrf.mxu2 }
 0x2c1   :  { %v518_v10 = vpop.f32.mrf.mxu2 }
 0x2c2   :  { %v532_v14 = vpack.c.bf16 %v518_v10, %v516_v9 }
 0x2c9   :  { %v521_v11 = vpop.f32.mrf.mxu2 }
 0x2d1   :  { %v523_v12 = vpop.f32.mrf.mxu2 }
 0x2d2   :  { %v533_v13 = vpack.c.bf16 %v523_v12, %v521_v11 }
 0x2d4   :  { %538 = vmatpush.bf16.msra.mxu3 %v533_v13 }
 0x2d8   :  { %539 = vmatpush.bf16.msra.mxu3 %v532_v14 }
 0x2dc   :  { %540 = vmatpush.bf16.msra.mxu3 %v531_v15 }
 0x2e0   :  { %541 = vmatpush.bf16.msra.mxu3 %v530_v16 }
 0x2e4   :  { %542 = vmatpush.bf16.msra.mxu3 %v529_v5 }
 0x2e8   :  { %543 = vmatpush.bf16.msra.mxu3 %v528_v2 }
 0x2ec   :  { %544 = vmatpush.bf16.msra.mxu3 %v527_v63 }
 0x2f0   :  { %545 = vmatpush.bf16.msra.mxu3 %v526_v60 }
 0x2f3   :  { %546 = vmatmul.bf16.vlgmr.msra.gmra.mxu3 %v1254_v40  ;;  %v1294_v40 = vld [vmem:[%s1529_s5] ss:$0 sm:$0xff]  ;;  %s1204_s5 = smov [#allocation10]  }
 0x2f4   :  { %s818_s18 = sshll.u32 %s1204_s5, 4  ;;  %s819_s18 = int_to_ptr.vmem [resolvable:$true] %s818_s18 }
 0x303   :  { %551 = vmatmul.bf16.gmra.mxu3 %v1257_v41 }
 0x313   :  { %556 = vmatmul.bf16.gmra.mxu3 %v1260_v42 }
 0x323   :  { %561 = vmatmul.bf16.gmra.mxu3 %v1263_v43 }
 0x333   :  { %566 = vmatmul.bf16.gmra.mxu3 %v1266_v44 }
 0x343   :  { %571 = vmatmul.bf16.gmra.mxu3 %v1269_v46 }
 0x353   :  { %576 = vmatmul.bf16.gmra.mxu3 %v1272_v51 }
 0x363   :  { %581 = vmatmul.bf16.gmra.mxu3 %v1275_v55 }
 0x376   :  { %v547_v41 = vpop.f32.mrf.mxu3 }
 0x377   :  { %v548_v42 = vadd.f32 %v1294_v40, %v547_v41 }
 0x379   :  { %v1300_v43 = vsel %vm589_vm0, %v548_v42, -inf }
 0x37a   :  { %606 = vmax.xlane.f32.xlu0 %v1300_v43 }
 0x37e   :  { %v549_v44 = vpop.f32.mrf.mxu3 }
 0x37f   :  { %v550_v46 = vadd.f32 %v1294_v40, %v549_v44 }
 0x381   :  { %v1306_v51 = vsel %vm589_vm0, %v550_v46, -inf }
 0x382   :  { %608 = vmax.xlane.f32.xlu0 %v1306_v51 }
 0x386   :  { %v552_v55 = vpop.f32.mrf.mxu3 }
 0x387   :  { %v553_v19 = vadd.f32 %v1294_v40, %v552_v55 }
 0x389   :  { %v1312_v20 = vsel %vm589_vm0, %v553_v19, -inf }
 0x38a   :  { %610 = vmax.xlane.f32.xlu1 %v1312_v20 }
 0x38e   :  { %v554_v21 = vpop.f32.mrf.mxu3 }
 0x38f   :  { %v555_v22 = vadd.f32 %v1294_v40, %v554_v21 }
 0x391   :  { %v1318_v23 = vsel %vm589_vm0, %v555_v22, -inf }
 0x392   :  { %612 = vmax.xlane.f32.xlu1 %v1318_v23 }
 0x396   :  { %v557_v24 = vpop.f32.mrf.mxu3 }
 0x397   :  { %v558_v25 = vadd.f32 %v1294_v40, %v557_v24 }
 0x399   :  { %v1324_v26 = vsel %vm589_vm0, %v558_v25, -inf }
 0x39a   :  { %614 = vmax.xlane.f32.xlu2 %v1324_v26 }
 0x39e   :  { %v559_v27 = vpop.f32.mrf.mxu3 }
 0x39f   :  { %v560_v28 = vadd.f32 %v1294_v40, %v559_v27 }
 0x3a1   :  { %v1330_v29 = vsel %vm589_vm0, %v560_v28, -inf }
 0x3a2   :  { %616 = vmax.xlane.f32.xlu2 %v1330_v29 }
 0x3a6   :  { %v562_v30 = vpop.f32.mrf.mxu3 }
 0x3a7   :  { %v563_v31 = vadd.f32 %v1294_v40, %v562_v30 }
 0x3a9   :  { %v1336_v32 = vsel %vm589_vm0, %v563_v31, -inf }
 0x3aa   :  { %618 = vmax.xlane.f32.xlu0 %v1336_v32 }
 0x3ae   :  { %v564_v33 = vpop.f32.mrf.mxu3 }
 0x3af   :  { %v565_v34 = vadd.f32 %v1294_v40, %v564_v33 }
 0x3b1   :  { %v1342_v35 = vsel %vm589_vm0, %v565_v34, -inf }
 0x3b2   :  { %620 = vmax.xlane.f32.xlu1 %v1342_v35 }
 0x3b6   :  { %v567_v36 = vpop.f32.mrf.mxu3 }
 0x3b7   :  { %v568_v37 = vadd.f32 %v1294_v40, %v567_v36 }
 0x3b9   :  { %v1348_v38 = vsel %vm589_vm0, %v568_v37, -inf }
 0x3ba   :  { %622 = vmax.xlane.f32.xlu2 %v1348_v38 }
 0x3be   :  { %v569_v39 = vpop.f32.mrf.mxu3 }
 0x3bf   :  { %v570_v45 = vadd.f32 %v1294_v40, %v569_v39 }
 0x3c1   :  { %v1354_v47 = vsel %vm589_vm0, %v570_v45, -inf }
 0x3c2   :  { %624 = vmax.xlane.f32.xlu0 %v1354_v47 }
 0x3c6   :  { %v572_v48 = vpop.f32.mrf.mxu3 }
 0x3c7   :  { %v573_v49 = vadd.f32 %v1294_v40, %v572_v48 }
 0x3c9   :  { %v1360_v50 = vsel %vm589_vm0, %v573_v49, -inf }
 0x3ca   :  { %626 = vmax.xlane.f32.xlu1 %v1360_v50 }
 0x3ce   :  { %v574_v52 = vpop.f32.mrf.mxu3 }
 0x3cf   :  { %v575_v53 = vadd.f32 %v1294_v40, %v574_v52 }
 0x3d1   :  { %v1366_v54 = vsel %vm589_vm0, %v575_v53, -inf }
 0x3d2   :  { %628 = vmax.xlane.f32.xlu2 %v1366_v54 }
 0x3d6   :  { %v577_v56 = vpop.f32.mrf.mxu3 }
 0x3d7   :  { %v578_v58 = vadd.f32 %v1294_v40, %v577_v56 }
 0x3d9   :  { %v1372_v59 = vsel %vm589_vm0, %v578_v58, -inf }
 0x3da   :  { %630 = vmax.xlane.f32.xlu0 %v1372_v59 }
 0x3de   :  { %v579_v60 = vpop.f32.mrf.mxu3 }
 0x3df   :  { %v580_v61 = vadd.f32 %v1294_v40, %v579_v60 }
 0x3e1   :  { %v1378_v62 = vsel %vm589_vm0, %v580_v61, -inf }
 0x3e2   :  { %632 = vmax.xlane.f32.xlu1 %v1378_v62 }
 0x3e6   :  { %v582_v63 = vpop.f32.mrf.mxu3 }
 0x3e7   :  { %v583_v0 = vadd.f32 %v1294_v40, %v582_v63 }
 0x3e9   :  { %v1384_v1 = vsel %vm589_vm0, %v583_v0, -inf }
 0x3ea   :  { %634 = vmax.xlane.f32.xlu2 %v1384_v1 }
 0x3ed   :  { %v1387_v2 = vpop.xlane.xlu0 %606 }
 0x3ee   :  { %v638_v3 = vsub.f32 %v1300_v43, %v1387_v2  ;;  %v584_v4 = vpop.f32.mrf.mxu3 }
 0x3ef   :  { %v585_v5 = vadd.f32 %v1294_v40, %v584_v4 }
 0x3f0   :  { %v654_v6 = vmul.f32 1.442695, %v638_v3 }
 0x3f1   :  { %v1394_v7 = vsel %vm589_vm0, %v585_v5, -inf }
 0x3f2   :  { %1006 = vpow2.f32 %v654_v6  ;;  %636 = vmax.xlane.f32.xlu0 %v1394_v7 }
 0x3f5   :  { %v1397_v8 = vpop.xlane.xlu0 %608 }
 0x3f6   :  { %v639_v57 = vsub.f32 %v1306_v51, %v1397_v8 }
 0x3f8   :  { %v1007_v9 = vpop.eup %1006  ;;  %v656_v10 = vmul.f32 1.442695, %v639_v57 }
 0x3f9   :  { %686 = vadd.xlane.f32.xlu1 %v1007_v9 }
 0x3fa   :  { %1008 = vpow2.f32 %v656_v10 }
 0x3fd   :  { %v1401_v11 = vpop.xlane.xlu1 %610 }
 0x3fe   :  { %v640_v12 = vsub.f32 %v1312_v20, %v1401_v11 }
 0x400   :  { %v1009_v13 = vpop.eup %1008  ;;  %v658_v14 = vmul.f32 1.442695, %v640_v12 }
 0x401   :  { %688 = vadd.xlane.f32.xlu2 %v1009_v13 }
 0x402   :  { %1010 = vpow2.f32 %v658_v14 }
 0x405   :  { %v1405_v15 = vpop.xlane.xlu1 %612 }
 0x406   :  { %v641_v16 = vsub.f32 %v1318_v23, %v1405_v15 }
 0x408   :  { %v1011_v17 = vpop.eup %1010  ;;  %v660_v40 = vmul.f32 1.442695, %v641_v16 }
 0x409   :  { %690 = vadd.xlane.f32.xlu0 %v1011_v17 }
 0x40a   :  { %1012 = vpow2.f32 %v660_v40 }
 0x40d   :  { %v1409_v41 = vpop.xlane.xlu2 %614 }
 0x40e   :  { %v642_v42 = vsub.f32 %v1324_v26, %v1409_v41 }
 0x410   :  { %v1013_v44 = vpop.eup %1012  ;;  %v662_v46 = vmul.f32 1.442695, %v642_v42 }
 0x411   :  { %692 = vadd.xlane.f32.xlu1 %v1013_v44 }
 0x412   :  { %1014 = vpow2.f32 %v662_v46 }
 0x415   :  { %v1413_v55 = vpop.xlane.xlu2 %616 }
 0x416   :  { %v643_v19 = vsub.f32 %v1330_v29, %v1413_v55 }
 0x418   :  { %v1015_v21 = vpop.eup %1014  ;;  %v664_v22 = vmul.f32 1.442695, %v643_v19 }
 0x419   :  { %694 = vadd.xlane.f32.xlu2 %v1015_v21 }
 0x41a   :  { %1016 = vpow2.f32 %v664_v22 }
 0x41d   :  { %v1417_v24 = vpop.xlane.xlu0 %618 }
 0x41e   :  { %v644_v25 = vsub.f32 %v1336_v32, %v1417_v24 }
 0x420   :  { %v1017_v27 = vpop.eup %1016  ;;  %v666_v28 = vmul.f32 1.442695, %v644_v25 }
 0x421   :  { %696 = vadd.xlane.f32.xlu0 %v1017_v27 }
 0x422   :  { %1018 = vpow2.f32 %v666_v28 }
 0x425   :  { %v1421_v30 = vpop.xlane.xlu1 %620 }
 0x426   :  { %v645_v31 = vsub.f32 %v1342_v35, %v1421_v30 }
 0x428   :  { %v1019_v33 = vpop.eup %1018  ;;  %v668_v34 = vmul.f32 1.442695, %v645_v31 }
 0x429   :  { %698 = vadd.xlane.f32.xlu1 %v1019_v33 }
 0x42a   :  { %1020 = vpow2.f32 %v668_v34 }
 0x42d   :  { %v1425_v36 = vpop.xlane.xlu2 %622 }
 0x42e   :  { %v646_v37 = vsub.f32 %v1348_v38, %v1425_v36 }
 0x430   :  { %v1021_v39 = vpop.eup %1020  ;;  %v670_v45 = vmul.f32 1.442695, %v646_v37 }
 0x431   :  { %700 = vadd.xlane.f32.xlu2 %v1021_v39 }
 0x432   :  { %1022 = vpow2.f32 %v670_v45 }
 0x435   :  { %v1429_v48 = vpop.xlane.xlu0 %624 }
 0x436   :  { %v647_v49 = vsub.f32 %v1354_v47, %v1429_v48 }
 0x438   :  { %v1023_v52 = vpop.eup %1022  ;;  %v672_v53 = vmul.f32 1.442695, %v647_v49 }
 0x439   :  { %702 = vadd.xlane.f32.xlu0 %v1023_v52 }
 0x43a   :  { %1024 = vpow2.f32 %v672_v53 }
 0x43d   :  { %v1433_v56 = vpop.xlane.xlu1 %626 }
 0x43e   :  { %v648_v58 = vsub.f32 %v1360_v50, %v1433_v56 }
 0x440   :  { %v1025_v60 = vpop.eup %1024  ;;  %v674_v61 = vmul.f32 1.442695, %v648_v58 }
 0x441   :  { %704 = vadd.xlane.f32.xlu1 %v1025_v60 }
 0x442   :  { %1026 = vpow2.f32 %v674_v61 }
 0x445   :  { %v1437_v63 = vpop.xlane.xlu2 %628 }
 0x446   :  { %v649_v0 = vsub.f32 %v1366_v54, %v1437_v63 }
 0x448   :  { %v1027_v3 = vpop.eup %1026  ;;  %v676_v4 = vmul.f32 1.442695, %v649_v0 }
 0x449   :  { %706 = vadd.xlane.f32.xlu2 %v1027_v3 }
 0x44a   :  { %1028 = vpow2.f32 %v676_v4 }
 0x44d   :  { %v1441_v5 = vpop.xlane.xlu0 %630 }
 0x44e   :  { %v650_v6 = vsub.f32 %v1372_v59, %v1441_v5 }
 0x450   :  { %v1029_v57 = vpop.eup %1028  ;;  %v678_v9 = vmul.f32 1.442695, %v650_v6 }
 0x451   :  { %708 = vadd.xlane.f32.xlu0 %v1029_v57 }
 0x452   :  { %1030 = vpow2.f32 %v678_v9 }
 0x455   :  { %v1445_v10 = vpop.xlane.xlu1 %632 }
 0x456   :  { %v651_v12 = vsub.f32 %v1378_v62, %v1445_v10 }
 0x458   :  { %v1031_v13 = vpop.eup %1030  ;;  %v680_v14 = vmul.f32 1.442695, %v651_v12 }
 0x459   :  { %710 = vadd.xlane.f32.xlu1 %v1031_v13 }
 0x45a   :  { %1032 = vpow2.f32 %v680_v14 }
 0x45d   :  { %v1449_v16 = vpop.xlane.xlu2 %634 }
 0x45e   :  { %v652_v17 = vsub.f32 %v1384_v1, %v1449_v16 }
 0x460   :  { %v1033_v40 = vpop.eup %1032  ;;  %v682_v42 = vmul.f32 1.442695, %v652_v17 }
 0x461   :  { %712 = vadd.xlane.f32.xlu2 %v1033_v40 }
 0x462   :  { %1034 = vpow2.f32 %v682_v42 }
 0x465   :  { %v1453_v44 = vpop.xlane.xlu0 %636 }
 0x466   :  { %v653_v46 = vsub.f32 %v1394_v7, %v1453_v44 }
 0x468   :  { %v1035_v19 = vpop.eup %1034  ;;  %v684_v21 = vmul.f32 1.442695, %v653_v46 }
 0x469   :  { %714 = vadd.xlane.f32.xlu0 %v1035_v19 }
 0x46a   :  { %1036 = vpow2.f32 %v684_v21 }
 0x46c   :  { %v687_v22 = vpop.xlane.xlu1 %686 }
 0x46d   :  { %1038 = vlog2.f32 %v687_v22 }
 0x470   :  { %v1037_v25 = vpop.eup %1036 }
 0x471   :  { %716 = vadd.xlane.f32.xlu1 %v1037_v25 }
 0x473   :  { %v1039_v27 = vpop.eup %1038 }
 0x474   :  { %v719_v28 = vmul.f32 0.6931472, %v1039_v27  ;;  %v689_v31 = vpop.xlane.xlu2 %688 }
 0x475   :  { %1040 = vlog2.f32 %v689_v31 }
 0x476   :  { %v750_v33 = vadd.f32 %v719_v28, %v1387_v2 }
 0x478   :  { %v766_v34 = vsub.f32 %v1300_v43, %v750_v33 }
 0x47a   :  { %v782_v37 = vsel %vm589_vm0, %v766_v34, 0.0 }
 0x47b   :  { %v1041_v39 = vpop.eup %1040  ;;  %798 = vst [vmem:[#allocation10] sm:$0xff] %v782_v37 }
 0x47c   :  { %v721_v45 = vmul.f32 0.6931472, %v1041_v39  ;;  %v691_v49 = vpop.xlane.xlu0 %690 }
 0x47d   :  { %1042 = vlog2.f32 %v691_v49 }
 0x47e   :  { %v751_v52 = vadd.f32 %v721_v45, %v1397_v8 }
 0x480   :  { %v767_v53 = vsub.f32 %v1306_v51, %v751_v52 }
 0x482   :  { %v783_v58 = vsel %vm589_vm0, %v767_v53, 0.0 }
 0x483   :  { %v1043_v60 = vpop.eup %1042  ;;  %799 = vst [vmem:[#allocation10 + $0x8] sm:$0xff] %v783_v58 }
 0x484   :  { %v723_v2 = vmul.f32 0.6931472, %v1043_v60  ;;  %v693_v61 = vpop.xlane.xlu1 %692 }
 0x485   :  { %1044 = vlog2.f32 %v693_v61 }
 0x486   :  { %v752_v43 = vadd.f32 %v723_v2, %v1401_v11 }
 0x488   :  { %v768_v0 = vsub.f32 %v1312_v20, %v752_v43 }
 0x48a   :  { %v784_v3 = vsel %vm589_vm0, %v768_v0, 0.0 }
 0x48b   :  { %v1045_v4 = vpop.eup %1044  ;;  %800 = vst [vmem:[#allocation10 + $0x10] sm:$0xff] %v784_v3 }
 0x48c   :  { %v725_v8 = vmul.f32 0.6931472, %v1045_v4  ;;  %v695_v6 = vpop.xlane.xlu2 %694 }
 0x48d   :  { %1046 = vlog2.f32 %v695_v6 }
 0x48e   :  { %v753_v51 = vadd.f32 %v725_v8, %v1405_v15 }
 0x490   :  { %v769_v57 = vsub.f32 %v1318_v23, %v753_v51 }
 0x492   :  { %v785_v9 = vsel %vm589_vm0, %v769_v57, 0.0 }
 0x493   :  { %v1047_v12 = vpop.eup %1046  ;;  %801 = vst [vmem:[#allocation10 + $0x18] sm:$0xff] %v785_v9 }
 0x494   :  { %v727_v11 = vmul.f32 0.6931472, %v1047_v12  ;;  %v697_v13 = vpop.xlane.xlu0 %696 }
 0x495   :  { %1048 = vlog2.f32 %v697_v13 }
 0x496   :  { %v754_v20 = vadd.f32 %v727_v11, %v1409_v41 }
 0x498   :  { %v770_v14 = vsub.f32 %v1324_v26, %v754_v20 }
 0x49a   :  { %v786_v17 = vsel %vm589_vm0, %v770_v14, 0.0 }
 0x49b   :  { %v1049_v40 = vpop.eup %1048  ;;  %802 = vst [vmem:[#allocation10 + $0x20] sm:$0xff] %v786_v17 }
 0x49c   :  { %v729_v15 = vmul.f32 0.6931472, %v1049_v40  ;;  %v699_v42 = vpop.xlane.xlu1 %698 }
 0x49d   :  { %1050 = vlog2.f32 %v699_v42 }
 0x49e   :  { %v755_v23 = vadd.f32 %v729_v15, %v1413_v55 }
 0x4a0   :  { %v771_v46 = vsub.f32 %v1330_v29, %v755_v23 }
 0x4a2   :  { %v787_v19 = vsel %vm589_vm0, %v771_v46, 0.0 }
 0x4a3   :  { %v1051_v21 = vpop.eup %1050  ;;  %803 = vst [vmem:[#allocation10 + $0x28] sm:$0xff] %v787_v19 }
 0x4a4   :  { %v731_v41 = vmul.f32 0.6931472, %v1051_v21  ;;  %v701_v22 = vpop.xlane.xlu2 %700 }
 0x4a5   :  { %1052 = vlog2.f32 %v701_v22 }
 0x4a6   :  { %v756_v26 = vadd.f32 %v731_v41, %v1417_v24 }
 0x4a8   :  { %v772_v25 = vsub.f32 %v1336_v32, %v756_v26 }
 0x4aa   :  { %v788_v27 = vsel %vm589_vm0, %v772_v25, 0.0 }
 0x4ab   :  { %v1053_v28 = vpop.eup %1052  ;;  %804 = vst [vmem:[#allocation10 + $0x30] sm:$0xff] %v788_v27 }
 0x4ac   :  { %v733_v55 = vmul.f32 0.6931472, %v1053_v28  ;;  %v703_v31 = vpop.xlane.xlu0 %702 }
 0x4ad   :  { %1054 = vlog2.f32 %v703_v31 }
 0x4ae   :  { %v757_v29 = vadd.f32 %v733_v55, %v1421_v30 }
 0x4b0   :  { %v773_v33 = vsub.f32 %v1342_v35, %v757_v29 }
 0x4b2   :  { %v789_v34 = vsel %vm589_vm0, %v773_v33, 0.0 }
 0x4b3   :  { %v1055_v37 = vpop.eup %1054  ;;  %805 = vst [vmem:[#allocation10 + $0x38] sm:$0xff] %v789_v34 }
 0x4b4   :  { %v735_v24 = vmul.f32 0.6931472, %v1055_v37  ;;  %v705_v39 = vpop.xlane.xlu1 %704 }
 0x4b5   :  { %1056 = vlog2.f32 %v705_v39 }
 0x4b6   :  { %v758_v32 = vadd.f32 %v735_v24, %v1425_v36 }
 0x4b8   :  { %v774_v45 = vsub.f32 %v1348_v38, %v758_v32 }
 0x4ba   :  { %v790_v49 = vsel %vm589_vm0, %v774_v45, 0.0 }
 0x4bb   :  { %v1057_v52 = vpop.eup %1056  ;;  %806 = vst [vmem:[#allocation10 + $0x40] sm:$0xff] %v790_v49 }
 0x4bc   :  { %v737_v30 = vmul.f32 0.6931472, %v1057_v52  ;;  %v707_v53 = vpop.xlane.xlu2 %706 }
 0x4bd   :  { %1058 = vlog2.f32 %v707_v53 }
 0x4be   :  { %v759_v35 = vadd.f32 %v737_v30, %v1429_v48 }
 0x4c0   :  { %v775_v58 = vsub.f32 %v1354_v47, %v759_v35 }
 0x4c2   :  { %v791_v60 = vsel %vm589_vm0, %v775_v58, 0.0 }
 0x4c3   :  { %v1059_v2 = vpop.eup %1058  ;;  %807 = vst [vmem:[#allocation10 + $0x48] sm:$0xff] %v791_v60 }
 0x4c4   :  { %v739_v36 = vmul.f32 0.6931472, %v1059_v2  ;;  %v709_v61 = vpop.xlane.xlu0 %708 }
 0x4c5   :  { %1060 = vlog2.f32 %v709_v61 }
 0x4c6   :  { %v760_v38 = vadd.f32 %v739_v36, %v1433_v56 }
 0x4c8   :  { %v776_v43 = vsub.f32 %v1360_v50, %v760_v38 }
 0x4ca   :  { %v792_v0 = vsel %vm589_vm0, %v776_v43, 0.0 }
 0x4cb   :  { %v1061_v3 = vpop.eup %1060  ;;  %808 = vst [vmem:[#allocation10 + $0x50] sm:$0xff] %v792_v0 }
 0x4cc   :  { %v741_v48 = vmul.f32 0.6931472, %v1061_v3  ;;  %v711_v4 = vpop.xlane.xlu1 %710 }
 0x4cd   :  { %1062 = vlog2.f32 %v711_v4 }
 0x4ce   :  { %v761_v47 = vadd.f32 %v741_v48, %v1437_v63 }
 0x4d0   :  { %v777_v8 = vsub.f32 %v1366_v54, %v761_v47 }
 0x4d2   :  { %v793_v6 = vsel %vm589_vm0, %v777_v8, 0.0 }
 0x4d3   :  { %v1063_v51 = vpop.eup %1062  ;;  %809 = vst [vmem:[#allocation10 + $0x58] sm:$0xff] %v793_v6 }
 0x4d4   :  { %v743_v56 = vmul.f32 0.6931472, %v1063_v51  ;;  %v713_v57 = vpop.xlane.xlu2 %712 }
 0x4d5   :  { %1064 = vlog2.f32 %v713_v57 }
 0x4d6   :  { %v762_v50 = vadd.f32 %v743_v56, %v1441_v5 }
 0x4d8   :  { %v778_v9 = vsub.f32 %v1372_v59, %v762_v50 }
 0x4da   :  { %v794_v12 = vsel %vm589_vm0, %v778_v9, 0.0 }
 0x4db   :  { %v1065_v11 = vpop.eup %1064  ;;  %810 = vst [vmem:[#allocation10 + $0x60] sm:$0xff] %v794_v12 }
 0x4dc   :  { %v745_v63 = vmul.f32 0.6931472, %v1065_v11  ;;  %v715_v13 = vpop.xlane.xlu0 %714 }
 0x4dd   :  { %1066 = vlog2.f32 %v715_v13 }
 0x4de   :  { %v763_v54 = vadd.f32 %v745_v63, %v1445_v10 }
 0x4e0   :  { %v779_v20 = vsub.f32 %v1378_v62, %v763_v54 }
 0x4e2   :  { %v795_v14 = vsel %vm589_vm0, %v779_v20, 0.0 }
 0x4e3   :  { %v1067_v17 = vpop.eup %1066  ;;  %811 = vst [vmem:[#allocation10 + $0x68] sm:$0xff] %v795_v14 }
 0x4e4   :  { %v747_v5 = vmul.f32 0.6931472, %v1067_v17  ;;  %v717_v40 = vpop.xlane.xlu1 %716 }
 0x4e5   :  { %1068 = vlog2.f32 %v717_v40 }
 0x4e6   :  { %v764_v59 = vadd.f32 %v747_v5, %v1449_v16 }
 0x4e8   :  { %v780_v15 = vsub.f32 %v1384_v1, %v764_v59 }
 0x4ea   :  { %v796_v42 = vsel %vm589_vm0, %v780_v15, 0.0 }
 0x4eb   :  { %v1069_v23 = vpop.eup %1068  ;;  %812 = vst [vmem:[#allocation10 + $0x70] sm:$0xff] %v796_v42 }
 0x4ec   :  { %v749_v10 = vmul.f32 0.6931472, %v1069_v23 }
 0x4ee   :  { %v765_v62 = vadd.f32 %v749_v10, %v1453_v44 }
 0x4f0   :  { %v781_v46 = vsub.f32 %v1394_v7, %v765_v62 }
 0x4f2   :  { %v797_v1 = vsel %vm589_vm0, %v781_v46, 0.0 }
 0x4f3   :  { %813 = vst [vmem:[#allocation10 + $0x78] sm:$0xff] %v797_v1 }
 0x4f4   :  { %826 = dma.vmem_to_hbm [thread:$0]  %s819_s18, 2048, %s821_s21, [#allocation4], %s1205_s22, %s1205_s22, %s1206_s23  }
 0x4f5   :  { %1196 = dma.done.wait [#allocation4], 2048  }
 0x4f6   :  { %1197 = vsyncadd [#allocation4], 4294965248 }
 0x4f7   :  { %831 = vsyncpa [#allocation3], 1 }
 0x4f8   :  { %832 = vsyncpa [#allocation6], 1 }
 0x4f9   :  { %833 = vsyncpa [#allocation9], 1 }
 0x4fa   :  { %834 = vsyncpa [#allocation4], 1 }

</bundles_post_ra>
